<compile_context>
chip_gen: v5e
topology: v5e:2x2
jax: 0.10.0
libtpu: 0.0.40
codegen_flags: <defaults>
</compile_context>

<pallas_src>
import jax
import jax.numpy as jnp
from jax.experimental import pallas as pl
from jax.experimental.pallas import tpu as pltpu

LANE = 128        # lane width (last dim of every tile)
SUB = 8           # sublane multiple (f32 output block rows)
TB_MAX = 8192     # max rows per grid step; 2 inputs double-buffered @ f32 = 16 MiB
ROW_ALIGN = 32    # block row multiple: satisfies f32(8)/bf16(16)/int8(32) sublane tiling


def _round_up(x, m):
    return (x + m - 1) // m * m


def _make_mape_kernel(tb, valid_rows, needs_mask):
    """Builds the per-tile partial-sum kernel (tb, valid_rows, needs_mask are static)."""

    def kernel(pred_ref, true_ref, o_ref):
        # Native-dtype loads, cast to f32 on the VPU (free vs. an extra HBM pass).
        p = pred_ref[...].astype(jnp.float32)
        t = true_ref[...].astype(jnp.float32)
        if needs_mask:
            # Last grid block overhangs the array: rows >= valid_rows contain
            # garbage from the partial DMA.  Mask t to 1.0 before the divide and
            # zero the masked terms so garbage never reaches the partial sums.
            row0 = pl.program_id(0) * tb
            rid = row0 + jax.lax.broadcasted_iota(jnp.int32, (tb, 1), 0)
            valid = rid < valid_rows
            t = jnp.where(valid, t, jnp.float32(1.0))
            term = jnp.where(valid, jnp.abs((p - t) / t), jnp.float32(0.0))
        else:
            term = jnp.abs((p - t) / t)
        # Reduce tb rows -> 8 sublane rows with vreg-wise VPU adds; output block
        # stays the lane-dense (8, 128) shape (unmasked stores).
        o_ref[...] = jnp.sum(term.reshape(tb // SUB, SUB, LANE), axis=0)

    return kernel


def mae_loss(pred, true, *, tb_max=TB_MAX):
    """mean(|(pred - true) / true|) over all elements (Pallas TPU)."""
    pred = jnp.asarray(pred)
    true = jnp.asarray(true)
    # Keep floating inputs in their native dtype (bf16 streams at half the bytes);
    # promote only non-float inputs so the division is well defined.
    if not jnp.issubdtype(pred.dtype, jnp.floating):
        pred = pred.astype(jnp.float32)
    if not jnp.issubdtype(true.dtype, jnp.floating):
        true = true.astype(jnp.float32)

    n = pred.size
    pred_f = pred.reshape(-1)   # contiguous reshape: free, no HBM pass
    true_f = true.reshape(-1)

    if n % LANE != 0:
        # TODO(synk): sub-128 tail still needs one pad pass (<=127 neutral
        # elements, pred=true=1 -> zero contribution); only hit when the element
        # count is not a multiple of 128.
        pad = LANE - n % LANE
        pred_f = jnp.pad(pred_f, (0, pad), constant_values=1)
        true_f = jnp.pad(true_f, (0, pad), constant_values=1)

    rows = pred_f.shape[0] // LANE
    tb = min(tb_max, _round_up(rows, ROW_ALIGN))
    num_tiles = pl.cdiv(rows, tb)
    needs_mask = (rows % tb) != 0   # last block overhangs -> mask garbage rows

    pred2 = pred_f.reshape(rows, LANE)   # free reshape to lane-dense 2D
    true2 = true_f.reshape(rows, LANE)

    partials = pl.pallas_call(
        _make_mape_kernel(tb, rows, needs_mask),
        out_shape=jax.ShapeDtypeStruct((num_tiles * SUB, LANE), jnp.float32),
        grid=(num_tiles,),
        in_specs=[
            pl.BlockSpec((tb, LANE), lambda i: (i, 0)),
            pl.BlockSpec((tb, LANE), lambda i: (i, 0)),
        ],
        out_specs=pl.BlockSpec((SUB, LANE), lambda i: (i, 0)),
        compiler_params=pltpu.CompilerParams(
            dimension_semantics=("parallel",),        # each step owns its output block
            vmem_limit_bytes=48 * 1024 * 1024,        # TB=8192 f32 double-buffered + temps
        ),
    )(pred2, true2)

    # Tiny XLA epilogue: (8*num_tiles, 128) partial sums -> scalar mean over the
    # TRUE element count n (padding / masked rows contributed exactly 0).
    return jnp.sum(partials) / jnp.float32(n)


# TODO(synk): the module's manual `backward(output, target)` helper
# (sign(output - target) / N) is a training-time hook, not part of the forward
# pass, and is intentionally not implemented here.

if __name__ == "__main__":
    key = jax.random.PRNGKey(0)
    kp, kt, ks, kp2, kt2, kp3, kt3, ks3, kp4, kt4 = jax.random.split(key, 10)

    # case 1: (B, 1) predictions vs targets — lane-aligned count, partial-tile
    # rows exercise the in-kernel mask path (no padding, no extra HBM pass).
    B = 1024
    pred = jax.random.normal(kp, (B, 1), jnp.float32)
    sign = jnp.where(jax.random.bernoulli(ks, 0.5, (B, 1)), 1.0, -1.0)
    true = sign * jax.random.uniform(kt, (B, 1), jnp.float32, 0.5, 2.0)
    loss = jax.block_until_ready(mae_loss(pred, true))
    ref = jnp.mean(jnp.abs((pred - true) / true))
    assert loss.shape == ()
    assert jnp.allclose(loss, ref, atol=1e-6, rtol=1e-5), (loss, ref)

    # case 2: non-lane-aligned element count -> tiny tail-pad fallback + mask.
    pred2 = jax.random.normal(kp2, (37, 17), jnp.float32)
    true2 = jax.random.uniform(kt2, (37, 17), jnp.float32, 0.5, 2.0)
    loss2 = jax.block_until_ready(mae_loss(pred2, true2))
    ref2 = jnp.mean(jnp.abs((pred2 - true2) / true2))
    assert jnp.allclose(loss2, ref2, atol=1e-6, rtol=1e-5), (loss2, ref2)

    # case 3: bf16 inputs streamed natively, cast to f32 inside the kernel.
    pred3 = jax.random.normal(kp3, (256, 128), jnp.float32).astype(jnp.bfloat16)
    sign3 = jnp.where(jax.random.bernoulli(ks3, 0.5, (256, 128)), 1.0, -1.0)
    true3 = (sign3 * jax.random.uniform(kt3, (256, 128), jnp.float32, 0.5, 2.0)
             ).astype(jnp.bfloat16)
    loss3 = jax.block_until_ready(mae_loss(pred3, true3))
    p3, t3 = pred3.astype(jnp.float32), true3.astype(jnp.float32)
    ref3 = jnp.mean(jnp.abs((p3 - t3) / t3))
    assert jnp.allclose(loss3, ref3, atol=1e-6, rtol=2e-5), (loss3, ref3)

    # case 4: multi-tile grid (tb capped small so grid > 1 is exercised).
    pred4 = jax.random.normal(kp4, (64, 128), jnp.float32)
    true4 = jax.random.uniform(kt4, (64, 128), jnp.float32, 0.5, 2.0)
    loss4 = jax.block_until_ready(mae_loss(pred4, true4, tb_max=32))
    ref4 = jnp.mean(jnp.abs((pred4 - true4) / true4))
    assert jnp.allclose(loss4, ref4, atol=1e-6, rtol=1e-5), (loss4, ref4)

    print("KERNEL_OK")
</pallas_src>

<mosaic_0001>
module attributes {stable_mosaic.version = 11 : i64} {
  func.func @kernel(%arg0: i32, %arg1: memref<32x128xf32, #tpu.memory_space<vmem>>, %arg2: memref<32x128xf32, #tpu.memory_space<vmem>>, %arg3: memref<8x128xf32, #tpu.memory_space<vmem>>) attributes {dimension_semantics = [#tpu.dimension_semantics<parallel>], iteration_bounds = array<i64: 1>, scalar_prefetch = 0 : i64, scratch_operands = 0 : i64, tpu.core_type = #tpu.core_type<tc>, window_params = [{transform_indices = @transform_0, window_bounds = array<i64: 32, 128>}, {transform_indices = @transform_1, window_bounds = array<i64: 32, 128>}, {transform_indices = @transform_2, window_bounds = array<i64: 8, 128>}]} {
    %c0 = arith.constant 0 : index
    %c0_0 = arith.constant 0 : index
    %0 = vector.load %arg1[%c0, %c0_0] : memref<32x128xf32, #tpu.memory_space<vmem>>, vector<32x128xf32>
    %c0_1 = arith.constant 0 : index
    %c0_2 = arith.constant 0 : index
    %1 = vector.load %arg2[%c0_1, %c0_2] : memref<32x128xf32, #tpu.memory_space<vmem>>, vector<32x128xf32>
    %c32_i32 = arith.constant 32 : i32
    %2 = arith.muli %arg0, %c32_i32 : i32
    %3 = tpu.iota {dimensions = array<i32: 0>} : vector<32x1xi32>
    %4 = vector.broadcast %2 : i32 to vector<32x1xi32>
    %5 = arith.addi %4, %3 : vector<32x1xi32>
    %c8_i32 = arith.constant 8 : i32
    %6 = vector.broadcast %c8_i32 : i32 to vector<32x1xi32>
    %7 = arith.cmpi slt, %5, %6 : vector<32x1xi32>
    %cst = arith.constant 1.000000e+00 : f32
    %8 = vector.shape_cast %7 : vector<32x1xi1> to vector<32x1xi1>
    %9 = vector.broadcast %8 : vector<32x1xi1> to vector<32x128xi1>
    %10 = vector.broadcast %cst : f32 to vector<32x128xf32>
    %11 = arith.select %9, %1, %10 : vector<32x128xi1>, vector<32x128xf32>
    %12 = arith.subf %0, %11 : vector<32x128xf32>
    %13 = arith.divf %12, %11 : vector<32x128xf32>
    %14 = math.absf %13 : vector<32x128xf32>
    %cst_3 = arith.constant 0.000000e+00 : f32
    %15 = vector.shape_cast %7 : vector<32x1xi1> to vector<32x1xi1>
    %16 = vector.broadcast %15 : vector<32x1xi1> to vector<32x128xi1>
    %17 = vector.broadcast %cst_3 : f32 to vector<32x128xf32>
    %18 = arith.select %16, %14, %17 : vector<32x128xi1>, vector<32x128xf32>
    %19 = vector.shape_cast %18 : vector<32x128xf32> to vector<4x8x128xf32>
    %cst_4 = arith.constant dense<0.000000e+00> : vector<8x128xf32>
    %20 = vector.multi_reduction <add>, %19, %cst_4 [0] : vector<4x8x128xf32> to vector<8x128xf32>
    %c0_5 = arith.constant 0 : index
    %c0_6 = arith.constant 0 : index
    %21 = vector.load %arg3[%c0_5, %c0_6] : memref<8x128xf32, #tpu.memory_space<vmem>>, vector<8x128xf32>
    tpu.vector_store %arg3[%c0_5, %c0_6], %20 {strides = array<i32>} : memref<8x128xf32, #tpu.memory_space<vmem>>, vector<8x128xf32>,
    return
  }
  func.func @transform_0(%arg0: i32) -> (i32, i32) {
    %c0_i32 = arith.constant 0 : i32
    %c0_i32_0 = arith.constant 0 : i32
    return %arg0, %c0_i32 : i32, i32
  }
  func.func @transform_1(%arg0: i32) -> (i32, i32) {
    %c0_i32 = arith.constant 0 : i32
    %c0_i32_0 = arith.constant 0 : i32
    return %arg0, %c0_i32 : i32, i32
  }
  func.func @transform_2(%arg0: i32) -> (i32, i32) {
    %c0_i32 = arith.constant 0 : i32
    %c0_i32_0 = arith.constant 0 : i32
    return %arg0, %c0_i32 : i32, i32
  }
}

</mosaic_0001>

<bundles_post_ra>
// kernel: tpu_custom_call.1
= control target key start
LH: loop header
LB: loop body
LE: loop exit
PB: predicated region body
PF: predicated region fallthrough
CT: control target
= control target key end

     0   :  { %7 = vsyncpa [#allocation3], 0  ;;  %s290_s0 = inlined_call_operand.hbm [shape: f32[8,128], index: 0, kind: input, shape index: {}]   ;;  %s291_s1 = inlined_call_operand.hbm [shape: f32[8,128], index: 1, kind: input, shape index: {}]   ;;  %s292_s2 = inlined_call_operand.hbm [shape: f32[8,128], index: 2, kind: output, shape index: {}]  }
   0x1   :  { %8 = vsyncpa [#allocation6], 0 }
   0x2   :  { %9 = vsyncpa [#allocation4], 0 }
   0x3   :  { %13 = vsyncadd [#allocation3], 384  ;;  %s14_s11 = sshll.u32 %s290_s0, 4  ;;  %s261_s12 = smov [#allocation2]   ;;  %s15_s11 = int_to_ptr.hbm [resolvable:$true] %s14_s11 }
   0x4   :  { %s16_s13 = sshll.u32 %s261_s12, 4  ;;  %s262_s14 = smov 128   ;;  %s17_s13 = int_to_ptr.vmem [resolvable:$true] %s16_s13 }
   0x5   :  { %s263_s15 = smov 8  }
   0x6   :  { %22 = dma.hbm_to_vmem [thread:$0]  %s15_s11, 128, %s17_s13, [#allocation3], %s262_s14, %s262_s14, %s263_s15  }
   0x7   :  { %26 = vsyncadd [#allocation6], 384  ;;  %s27_s18 = sshll.u32 %s291_s1, 4  ;;  %s264_s19 = smov [#allocation5]   ;;  %s28_s18 = int_to_ptr.hbm [resolvable:$true] %s27_s18 }
   0x8   :  { %s29_s20 = sshll.u32 %s264_s19, 4  ;;  %s30_s20 = int_to_ptr.vmem [resolvable:$true] %s29_s20 }
   0x9   :  { %35 = dma.hbm_to_vmem [thread:$0]  %s28_s18, 128, %s30_s20, [#allocation6], %s262_s14, %s262_s14, %s263_s15  }
   0xa   :  { %255 = dma.done.wait [#allocation3], 512  }
   0xb   :  { %256 = vsyncadd [#allocation3], 4294966784 }
   0xc   :  { %257 = dma.done.wait [#allocation6], 512  }
   0xd   :  { %258 = vsyncadd [#allocation6], 4294966784  ;;  %v48_v0 = vld [vmem:[#allocation5] sm:$0xff]  ;;  %s265_s0 = smov [#allocation7]   ;;  %s162_s23 = sshll.u32 %s292_s2, 4  ;;  %s163_s23 = int_to_ptr.hbm [resolvable:$true] %s162_s23 }
   0xe   :  { %181 = vrcp.f32 %v48_v0  ;;  %v94_v3 = vand.u32 2147483648, %v48_v0  ;;  %vm88_vm0 = vweird.f32 %v48_v0  ;;  %v92_v5 = vand.u32 2147483647, %v48_v0  ;;  %v44_v6 = vld [vmem:[#allocation2] sm:$0xff]  ;;  %s160_s1 = sshll.u32 %s265_s0, 4  ;;  %s161_s1 = int_to_ptr.vmem [resolvable:$true] %s160_s1 }
   0xf   :  { %v79_v9 = vsub.f32 %v44_v6, %v48_v0 }
  0x10   :  { %v95_v8 = vor.u32 1.1754944e-38, %v94_v3  ;;  %vm93_vm3 = vcmp.eq.f32.partialorder %v92_v5, 8.507059e+37 }
  0x14   :  { %v182_v1 = vpop.eup %181 }
  0x15   :  { %v84_v2 = vmul.f32 %v182_v1, %v48_v0  ;;  %vm89_vm1 = vweird.f32 %v182_v1 }
  0x16   :  { %vm90_vm2 = vmor %vm88_vm0, %vm89_vm1 }
  0x17   :  { %v85_v4 = vsub.f32 1.0, %v84_v2 }
  0x19   :  { %v86_v7 = vmul.f32 %v182_v1, %v85_v4 }
  0x1b   :  { %v87_v10 = vadd.f32 %v182_v1, %v86_v7 }
  0x1d   :  { %v91_v11 = vsel %vm90_vm2, %v182_v1, %v87_v10 }
  0x1e   :  { %v96_v12 = vsel %vm93_vm3, %v95_v8, %v91_v11 }
  0x1f   :  { %v97_v13 = vmul.f32 %v96_v12, %v79_v9 }
  0x21   :  { %v143_v14 = vand.u32 2147483647, %v97_v13 }
  0x23   :  { %154 = vst [vmem:[#allocation7] sm:$0xff] %v143_v14 }
  0x24   :  { %165 = dma.vmem_to_hbm [thread:$0]  %s161_s1, 128, %s163_s23, [#allocation4]  }
  0x25   :  { %259 = dma.done.wait [#allocation4], 128  }
  0x26   :  { %260 = vsyncadd [#allocation4], 4294967168 }
  0x27   :  { %170 = vsyncpa [#allocation3], 1 }
  0x28   :  { %171 = vsyncpa [#allocation6], 1 }
  0x29   :  { %172 = vsyncpa [#allocation4], 1 }

</bundles_post_ra>
